<compile_context>
chip_gen: v5e
topology: v5e:2x2
jax: 0.10.0
libtpu: 0.0.40
codegen_flags: <defaults>
</compile_context>

<pallas_src>
import numpy as np

import jax
import jax.numpy as jnp
from jax.experimental import pallas as pl
from jax.experimental.pallas import tpu as pltpu

LANE = 128  # TPU lane width


def _proto_net_kernel(s_ref, q_ref, w_ref, b_ref, avg_ref, o_ref,
                      acc_s_ref, acc_q_ref):
    k = pl.program_id(0)

    @pl.when(k == 0)
    def _init():
        # Fold the (f32) bias into the accumulator init, done once.
        bias = b_ref[...]
        acc_s_ref[...] = jnp.broadcast_to(bias, acc_s_ref.shape)
        acc_q_ref[...] = jnp.broadcast_to(bias, acc_q_ref.shape)

    # K-tiled embedding matmul (bf16 operands, f32 accumulation on the MXU).
    acc_s_ref[...] += jnp.dot(s_ref[...], w_ref[...],
                              preferred_element_type=jnp.float32)
    acc_q_ref[...] += jnp.dot(q_ref[...], w_ref[...],
                              preferred_element_type=jnp.float32)

    @pl.when(k == pl.num_programs(0) - 1)
    def _finalize():
        # ReLU epilogue, all in f32 from the accumulators.
        s_emb = jnp.maximum(acc_s_ref[...], 0.0)        # [ns_pad, D]
        q_emb = jnp.maximum(acc_q_ref[...], 0.0)        # [nq_pad, D]

        # Prototype mean as a matmul with the precomputed class-averaging
        # matrix (rows >= n_classes are all-zero -> padded prototypes are 0).
        protos = jnp.dot(avg_ref[...], s_emb,
                         preferred_element_type=jnp.float32)   # [c_pad, D]

        # Negative Euclidean cdist in matmul form (MXU):
        #   d2 = ||q||^2 + ||p||^2 - 2 q.p^T
        nt = (((1,), (1,)), ((), ()))                    # contract last dims
        cross = jax.lax.dot_general(q_emb, protos, nt,
                                    preferred_element_type=jnp.float32)
        # ||p||^2 broadcast via a single-row ones matmul (no full-size ones).
        pn = jax.lax.dot_general(jnp.ones((1, q_emb.shape[1]), jnp.float32),
                                 protos * protos, nt,
                                 preferred_element_type=jnp.float32)  # [1, c_pad]
        qn = jnp.sum(q_emb * q_emb, axis=-1, keepdims=True)           # [nq_pad, 1]
        d2 = jnp.maximum(qn + pn - 2.0 * cross, 0.0)     # clamp rounding noise
        o_ref[...] = -jnp.sqrt(d2)                       # lane-dense [nq_pad, c_pad]


def _round_up(x, m):
    return ((x + m - 1) // m) * m


def _vmem_budget_bytes():
    # Generation-aware budget: stay well under the scoped VMEM limit; the
    # 32 MiB cap is safe on v5e/v6e (128 MiB physical) and v7x (64 MiB).
    try:
        cap = pltpu.get_tpu_info().vmem_capacity_bytes
    except Exception:
        cap = 64 * 1024 * 1024
    return min(cap // 2, 32 * 1024 * 1024)


def _pick_tk(f, ns_pad, nq_pad, d, c_pad, budget_bytes):
    fixed = (ns_pad + nq_pad) * d * 4                           # f32 accumulators
    fixed += 2 * (c_pad * ns_pad + d + nq_pad * c_pad) * 4      # avg / bias / out
    for tk in (8192, 4096, 2048, 1024, 512, 256, 128):
        if tk > f or f % tk != 0:
            continue
        # bf16 x-blocks (support + query) and w-block, double-buffered.
        stream = 2 * 2 * tk * (ns_pad + nq_pad + d)
        if fixed + stream <= budget_bytes:
            return tk
    return f                                                    # tiny / odd F


def _pad_rows(x, target):
    if x.shape[0] == target:
        return x
    return jnp.pad(x, ((0, target - x.shape[0]), (0, 0)))


def prototypical_network_forward(support, query, w, b,
                                 n_classes, n_support, n_query):
    """support/query: NCHW images; w: [F, D]; b: [1, D]; returns -cdist."""
    assert n_support % n_classes == 0, "n_support must be divisible by n_classes"
    # Support rows are assumed class-major ordered (class i occupies rows
    # [i*n_per, (i+1)*n_per)), matching torch .view(n_classes, n_per, -1).

    s_flat = support.reshape(n_support, -1)                 # torch .view(N, -1)
    q_flat = query.reshape(n_query, -1)
    f = s_flat.shape[1]
    d = w.shape[1]

    ns_pad = _round_up(n_support, 8)                        # sublane alignment
    nq_pad = _round_up(n_query, 8)
    c_pad = _round_up(n_classes, LANE)                      # lane-dense output

    # bf16 streaming of activations + weights; f32 bias kept for the epilogue.
    s_bf = _pad_rows(s_flat, ns_pad).astype(jnp.bfloat16)
    q_bf = _pad_rows(q_flat, nq_pad).astype(jnp.bfloat16)
    w_bf = w.astype(jnp.bfloat16)
    b_f32 = b.astype(jnp.float32).reshape(1, d)

    # Compile-time class-averaging matrix (prototype mean as a matmul).
    n_per = n_support // n_classes
    avg_np = np.zeros((c_pad, ns_pad), np.float32)
    for c in range(n_classes):
        avg_np[c, c * n_per:(c + 1) * n_per] = 1.0 / n_per
    avg = jnp.asarray(avg_np)

    tk = _pick_tk(f, ns_pad, nq_pad, d, c_pad, _vmem_budget_bytes())

    out_padded = pl.pallas_call(
        _proto_net_kernel,
        out_shape=jax.ShapeDtypeStruct((nq_pad, c_pad), jnp.float32),
        grid_spec=pltpu.PrefetchScalarGridSpec(
            num_scalar_prefetch=0,
            grid=(f // tk,),                                # K (reduction) axis
            in_specs=[
                pl.BlockSpec((ns_pad, tk), lambda k: (0, k)),      # support
                pl.BlockSpec((nq_pad, tk), lambda k: (0, k)),      # query
                pl.BlockSpec((tk, d), lambda k: (k, 0)),           # w (bf16)
                pl.BlockSpec((1, d), lambda k: (0, 0)),            # bias (f32)
                pl.BlockSpec((c_pad, ns_pad), lambda k: (0, 0)),   # avg matrix
            ],
            out_specs=pl.BlockSpec((nq_pad, c_pad), lambda k: (0, 0)),
            scratch_shapes=[pltpu.VMEM((ns_pad, d), jnp.float32),
                            pltpu.VMEM((nq_pad, d), jnp.float32)],
        ),
        compiler_params=pltpu.CompilerParams(
            dimension_semantics=("arbitrary",),             # reduction axis
            vmem_limit_bytes=32 * 1024 * 1024,              # safe on all gens
        ),
    )(s_bf, q_bf, w_bf, b_f32, avg)
    return out_padded[:n_query, :n_classes]                 # strip padding


if __name__ == "__main__":
    key = jax.random.PRNGKey(0)
    k_s, k_q, k_w, k_b = jax.random.split(key, 4)

    # small shapes consistent with the module's forward
    n_classes, n_support, n_query = 4, 8, 8                 # 2 support shots/class
    C, H, W = 4, 16, 16
    D = 128                                                 # lane-width embedding
    F = C * H * W

    support = jax.random.normal(k_s, (n_support, C, H, W), jnp.float32)
    query = jax.random.normal(k_q, (n_query, C, H, W), jnp.float32)

    # deterministic synthetic parameters for the embedding net (Linear F->D)
    w = jax.random.normal(k_w, (F, D), jnp.float32) * 0.02
    b = jax.random.normal(k_b, (1, D), jnp.float32) * 0.02

    out = prototypical_network_forward(support, query, w, b,
                                       n_classes, n_support, n_query)
    out = jax.block_until_ready(out)

    # pure-JAX reference of the PyTorch forward, using the same bf16-rounded
    # streamed operands (f32 math) so the comparison isolates kernel errors.
    s32 = support.reshape(n_support, -1).astype(jnp.bfloat16).astype(jnp.float32)
    q32 = query.reshape(n_query, -1).astype(jnp.bfloat16).astype(jnp.float32)
    w32 = w.astype(jnp.bfloat16).astype(jnp.float32)
    s_emb = jnp.maximum(s32 @ w32 + b, 0.0)
    q_emb = jnp.maximum(q32 @ w32 + b, 0.0)
    protos = s_emb.reshape(n_classes, n_support // n_classes, -1).mean(axis=1)
    ref = -jnp.sqrt(jnp.sum((q_emb[:, None, :] - protos[None, :, :]) ** 2,
                            axis=-1))

    assert out.shape == (n_query, n_classes)
    assert bool(jnp.all(out <= 0.0))                        # -dists is non-positive
    assert bool(jnp.allclose(out, ref, rtol=1e-2, atol=2e-2))
    print("KERNEL_OK")
</pallas_src>

<mosaic_0001>
module attributes {stable_mosaic.version = 11 : i64} {
  func.func @_proto_net_kernel(%arg0: i32, %arg1: memref<8x1024xbf16, #tpu.memory_space<vmem>>, %arg2: memref<8x1024xbf16, #tpu.memory_space<vmem>>, %arg3: memref<1024x128xbf16, #tpu.memory_space<vmem>>, %arg4: memref<1x128xf32, #tpu.memory_space<vmem>>, %arg5: memref<128x8xf32, #tpu.memory_space<vmem>>, %arg6: memref<8x128xf32, #tpu.memory_space<vmem>>, %arg7: memref<8x128xf32, #tpu.memory_space<vmem>>, %arg8: memref<8x128xf32, #tpu.memory_space<vmem>>) attributes {dimension_semantics = [#tpu.dimension_semantics<arbitrary>], iteration_bounds = array<i64: 1>, scalar_prefetch = 0 : i64, scratch_operands = 2 : i64, tpu.core_type = #tpu.core_type<tc>, window_params = [{transform_indices = @transform_0, window_bounds = array<i64: 8, 1024>}, {transform_indices = @transform_1, window_bounds = array<i64: 8, 1024>}, {transform_indices = @transform_2, window_bounds = array<i64: 1024, 128>}, {pipeline_mode = #tpu.pipeline_mode<synchronous>, transform_indices = @transform_3, window_bounds = array<i64: 1, 128>}, {pipeline_mode = #tpu.pipeline_mode<synchronous>, transform_indices = @transform_4, window_bounds = array<i64: 128, 8>}, {pipeline_mode = #tpu.pipeline_mode<synchronous>, transform_indices = @transform_5, window_bounds = array<i64: 8, 128>}]} {
    %c0_i32 = arith.constant 0 : i32
    %0 = arith.cmpi eq, %arg0, %c0_i32 : i32
    %1 = arith.extui %0 : i1 to i32
    %c0_i32_0 = arith.constant 0 : i32
    %2 = arith.cmpi ne, %1, %c0_i32_0 : i32
    scf.if %2 {
      %c0_19 = arith.constant 0 : index
      %c0_20 = arith.constant 0 : index
      %18 = vector.load %arg4[%c0_19, %c0_20] : memref<1x128xf32, #tpu.memory_space<vmem>>, vector<1x128xf32>
      %19 = vector.shape_cast %18 : vector<1x128xf32> to vector<1x128xf32>
      %20 = vector.broadcast %19 : vector<1x128xf32> to vector<8x128xf32>
      %c0_21 = arith.constant 0 : index
      %c0_22 = arith.constant 0 : index
      %21 = vector.load %arg7[%c0_21, %c0_22] : memref<8x128xf32, #tpu.memory_space<vmem>>, vector<8x128xf32>
      tpu.vector_store %arg7[%c0_21, %c0_22], %20 {strides = array<i32>} : memref<8x128xf32, #tpu.memory_space<vmem>>, vector<8x128xf32>,
      %22 = vector.shape_cast %18 : vector<1x128xf32> to vector<1x128xf32>
      %23 = vector.broadcast %22 : vector<1x128xf32> to vector<8x128xf32>
      %c0_23 = arith.constant 0 : index
      %c0_24 = arith.constant 0 : index
      %24 = vector.load %arg8[%c0_23, %c0_24] : memref<8x128xf32, #tpu.memory_space<vmem>>, vector<8x128xf32>
      tpu.vector_store %arg8[%c0_23, %c0_24], %23 {strides = array<i32>} : memref<8x128xf32, #tpu.memory_space<vmem>>, vector<8x128xf32>,
    } else {
    }
    %c0 = arith.constant 0 : index
    %c0_1 = arith.constant 0 : index
    %3 = vector.load %arg7[%c0, %c0_1] : memref<8x128xf32, #tpu.memory_space<vmem>>, vector<8x128xf32>
    %c0_2 = arith.constant 0 : index
    %c0_3 = arith.constant 0 : index
    %4 = vector.load %arg1[%c0_2, %c0_3] : memref<8x1024xbf16, #tpu.memory_space<vmem>>, vector<8x1024xbf16>
    %c0_4 = arith.constant 0 : index
    %c0_5 = arith.constant 0 : index
    %5 = vector.load %arg3[%c0_4, %c0_5] : memref<1024x128xbf16, #tpu.memory_space<vmem>>, vector<1024x128xbf16>
    %cst = arith.constant dense<0.000000e+00> : vector<8x128xf32>
    %6 = tpu.matmul %4, %5, %cst {dimension_numbers = #tpu.dot_dimension_numbers<[1], [0], [0], [1], [0, 0, 1, 1], [], []>} : vector<8x1024xbf16>, vector<1024x128xbf16>, vector<8x128xf32> -> vector<8x128xf32>
    %7 = arith.addf %3, %6 : vector<8x128xf32>
    %c0_6 = arith.constant 0 : index
    %c0_7 = arith.constant 0 : index
    %8 = vector.load %arg7[%c0_6, %c0_7] : memref<8x128xf32, #tpu.memory_space<vmem>>, vector<8x128xf32>
    tpu.vector_store %arg7[%c0_6, %c0_7], %7 {strides = array<i32>} : memref<8x128xf32, #tpu.memory_space<vmem>>, vector<8x128xf32>,
    %c0_8 = arith.constant 0 : index
    %c0_9 = arith.constant 0 : index
    %9 = vector.load %arg8[%c0_8, %c0_9] : memref<8x128xf32, #tpu.memory_space<vmem>>, vector<8x128xf32>
    %c0_10 = arith.constant 0 : index
    %c0_11 = arith.constant 0 : index
    %10 = vector.load %arg2[%c0_10, %c0_11] : memref<8x1024xbf16, #tpu.memory_space<vmem>>, vector<8x1024xbf16>
    %c0_12 = arith.constant 0 : index
    %c0_13 = arith.constant 0 : index
    %11 = vector.load %arg3[%c0_12, %c0_13] : memref<1024x128xbf16, #tpu.memory_space<vmem>>, vector<1024x128xbf16>
    %cst_14 = arith.constant dense<0.000000e+00> : vector<8x128xf32>
    %12 = tpu.matmul %10, %11, %cst_14 {dimension_numbers = #tpu.dot_dimension_numbers<[1], [0], [0], [1], [0, 0, 1, 1], [], []>} : vector<8x1024xbf16>, vector<1024x128xbf16>, vector<8x128xf32> -> vector<8x128xf32>
    %13 = arith.addf %9, %12 : vector<8x128xf32>
    %c0_15 = arith.constant 0 : index
    %c0_16 = arith.constant 0 : index
    %14 = vector.load %arg8[%c0_15, %c0_16] : memref<8x128xf32, #tpu.memory_space<vmem>>, vector<8x128xf32>
    tpu.vector_store %arg8[%c0_15, %c0_16], %13 {strides = array<i32>} : memref<8x128xf32, #tpu.memory_space<vmem>>, vector<8x128xf32>,
    %c0_i32_17 = arith.constant 0 : i32
    %15 = arith.cmpi eq, %arg0, %c0_i32_17 : i32
    %16 = arith.extui %15 : i1 to i32
    %c0_i32_18 = arith.constant 0 : i32
    %17 = arith.cmpi ne, %16, %c0_i32_18 : i32
    scf.if %17 {
      %c0_19 = arith.constant 0 : index
      %c0_20 = arith.constant 0 : index
      %18 = vector.load %arg7[%c0_19, %c0_20] : memref<8x128xf32, #tpu.memory_space<vmem>>, vector<8x128xf32>
      %cst_21 = arith.constant 0.000000e+00 : f32
      %19 = vector.broadcast %cst_21 : f32 to vector<8x128xf32>
      %20 = arith.maximumf %18, %19 : vector<8x128xf32>
      %c0_22 = arith.constant 0 : index
      %c0_23 = arith.constant 0 : index
      %21 = vector.load %arg8[%c0_22, %c0_23] : memref<8x128xf32, #tpu.memory_space<vmem>>, vector<8x128xf32>
      %cst_24 = arith.constant 0.000000e+00 : f32
      %22 = vector.broadcast %cst_24 : f32 to vector<8x128xf32>
      %23 = arith.maximumf %21, %22 : vector<8x128xf32>
      %c0_25 = arith.constant 0 : index
      %c0_26 = arith.constant 0 : index
      %24 = vector.load %arg5[%c0_25, %c0_26] : memref<128x8xf32, #tpu.memory_space<vmem>>, vector<128x8xf32>
      %cst_27 = arith.constant dense<0.000000e+00> : vector<128x128xf32>
      %25 = tpu.matmul %24, %20, %cst_27 {dimension_numbers = #tpu.dot_dimension_numbers<[1], [0], [0], [1], [0, 0, 1, 1], [], []>} : vector<128x8xf32>, vector<8x128xf32>, vector<128x128xf32> -> vector<128x128xf32>
      %cst_28 = arith.constant dense<0.000000e+00> : vector<8x128xf32>
      %26 = tpu.matmul %23, %25, %cst_28 {dimension_numbers = #tpu.dot_dimension_numbers<[1], [1], [0], [0], [0, 0, 1, 0], [], []>} : vector<8x128xf32>, vector<128x128xf32>, vector<8x128xf32> -> vector<8x128xf32>
      %cst_29 = arith.constant 1.000000e+00 : f32
      %27 = vector.broadcast %cst_29 : f32 to vector<1x128xf32>
      %28 = arith.mulf %25, %25 : vector<128x128xf32>
      %cst_30 = arith.constant dense<0.000000e+00> : vector<1x128xf32>
      %29 = tpu.matmul %27, %28, %cst_30 {dimension_numbers = #tpu.dot_dimension_numbers<[1], [1], [0], [0], [0, 0, 1, 0], [], []>} : vector<1x128xf32>, vector<128x128xf32>, vector<1x128xf32> -> vector<1x128xf32>
      %30 = arith.mulf %23, %23 : vector<8x128xf32>
      %cst_31 = arith.constant dense<0.000000e+00> : vector<8xf32>
      %31 = vector.multi_reduction <add>, %30, %cst_31 [1] : vector<8x128xf32> to vector<8xf32>
      %32 = vector.shape_cast %31 : vector<8xf32> to vector<8x1xf32>
      %33 = vector.broadcast %32 : vector<8x1xf32> to vector<8x128xf32>
      %34 = vector.broadcast %29 : vector<1x128xf32> to vector<8x128xf32>
      %35 = arith.addf %33, %34 : vector<8x128xf32>
      %cst_32 = arith.constant 2.000000e+00 : f32
      %36 = vector.broadcast %cst_32 : f32 to vector<8x128xf32>
      %37 = arith.mulf %36, %26 : vector<8x128xf32>
      %38 = arith.subf %35, %37 : vector<8x128xf32>
      %cst_33 = arith.constant 0.000000e+00 : f32
      %39 = vector.broadcast %cst_33 : f32 to vector<8x128xf32>
      %40 = arith.maximumf %38, %39 : vector<8x128xf32>
      %41 = math.sqrt %40 : vector<8x128xf32>
      %cst_34 = arith.constant 0.000000e+00 : f32
      %42 = vector.broadcast %cst_34 : f32 to vector<8x128xf32>
      %43 = arith.subf %42, %41 : vector<8x128xf32>
      %c0_35 = arith.constant 0 : index
      %c0_36 = arith.constant 0 : index
      %44 = vector.load %arg6[%c0_35, %c0_36] : memref<8x128xf32, #tpu.memory_space<vmem>>, vector<8x128xf32>
      tpu.vector_store %arg6[%c0_35, %c0_36], %43 {strides = array<i32>} : memref<8x128xf32, #tpu.memory_space<vmem>>, vector<8x128xf32>,
    } else {
    }
    return
  }
  func.func @transform_0(%arg0: i32) -> (i32, i32) {
    %c0_i32 = arith.constant 0 : i32
    %c0_i32_0 = arith.constant 0 : i32
    return %c0_i32, %arg0 : i32, i32
  }
  func.func @transform_1(%arg0: i32) -> (i32, i32) {
    %c0_i32 = arith.constant 0 : i32
    %c0_i32_0 = arith.constant 0 : i32
    return %c0_i32, %arg0 : i32, i32
  }
  func.func @transform_2(%arg0: i32) -> (i32, i32) {
    %c0_i32 = arith.constant 0 : i32
    %c0_i32_0 = arith.constant 0 : i32
    return %arg0, %c0_i32 : i32, i32
  }
  func.func @transform_3(%arg0: i32) -> (i32, i32) {
    %c0_i32 = arith.constant 0 : i32
    %c0_i32_0 = arith.constant 0 : i32
    %c0_i32_1 = arith.constant 0 : i32
    return %c0_i32, %c0_i32_0 : i32, i32
  }
  func.func @transform_4(%arg0: i32) -> (i32, i32) {
    %c0_i32 = arith.constant 0 : i32
    %c0_i32_0 = arith.constant 0 : i32
    %c0_i32_1 = arith.constant 0 : i32
    return %c0_i32, %c0_i32_0 : i32, i32
  }
  func.func @transform_5(%arg0: i32) -> (i32, i32) {
    %c0_i32 = arith.constant 0 : i32
    %c0_i32_0 = arith.constant 0 : i32
    %c0_i32_1 = arith.constant 0 : i32
    return %c0_i32, %c0_i32_0 : i32, i32
  }
}

</mosaic_0001>

<bundles_post_ra>
// kernel: tpu_custom_call.1
= control target key start
LH: loop header
LB: loop body
LE: loop exit
PB: predicated region body
PF: predicated region fallthrough
CT: control target
= control target key end

     0   :  { %10 = vsyncpa [#allocation5], 0  ;;  %s2439_s0 = inlined_call_operand.vmem [shape: bf16[8,1024], index: 0, kind: input, shape index: {}]   ;;  %s2440_s1 = inlined_call_operand.vmem [shape: bf16[8,1024], index: 1, kind: input, shape index: {}]   ;;  %s2441_s2 = inlined_call_operand.hbm [shape: bf16[1024,128], index: 2, kind: input, shape index: {}]   ;;  %s2442_s3 = inlined_call_operand.vmem [shape: f32[1,128], index: 3, kind: input, shape index: {}]   ;;  %s2443_s4 = inlined_call_operand.vmem [shape: f32[128,8], index: 4, kind: input, shape index: {}]   ;;  %s2444_s5 = inlined_call_operand.hbm [shape: f32[8,128], index: 5, kind: output, shape index: {}]  }
   0x1   :  { %11 = vsyncpa [#allocation6], 0  ;;  %s20_s20 = sshll.u32 %s2441_s2, 4  ;;  %s2298_s21 = smov [#allocation4]   ;;  %s21_s20 = int_to_ptr.hbm [resolvable:$true] %s20_s20 }
   0x2   :  { %s22_s22 = sshll.u32 %s2298_s21, 4  ;;  %s2299_s23 = smov 64   ;;  %s23_s22 = int_to_ptr.vmem [resolvable:$true] %s22_s22 }
   0x3   :  { %s2300_s24 = smov 4  }
   0x4   :  { %28 = dma.hbm_to_vmem [thread:$0]  %s21_s20, 8192, %s23_s22, [#allocation5], %s2299_s23, %s2299_s23, %s2300_s24  }
   0x5   :  { %2294 = dma.done.wait [#allocation5], 8192  }
   0x6   :  { %2295 = vsyncadd [#allocation5], 4294959104  ;;  %v2116_v0 = vld [vmem:[#allocation4 + $0x38] sm:$0xff]  ;;  %v2115_v4 = vld [vmem:[#allocation4 + $0x30] sm:$0xff]  ;;  %vm1372_vm0 = vcmask 64512   ;;  %s1571_s20 = sshll.u32 %s2444_s5, 4  ;;  %s1572_s20 = int_to_ptr.hbm [resolvable:$true] %s1571_s20 }
   0x7   :  { %v2124_v1 = vld [vmem:[#allocation4 + $0x78] sm:$0xff]  ;;  %592 = vmatpush.bf16.msra.mxu0 %v2116_v0  ;;  %v2123_v5 = vld [vmem:[#allocation4 + $0x70] sm:$0xff]  ;;  %v2114_v8 = vld [vmem:[#allocation4 + $0x28] sm:$0xff] }
   0x8   :  { %v2132_v2 = vld [vmem:[#allocation4 + $0xb8] sm:$0xff]  ;;  %605 = vmatpush.bf16.msra.mxu1 %v2124_v1  ;;  %v2131_v6 = vld [vmem:[#allocation4 + $0xb0] sm:$0xff]  ;;  %v2122_v9 = vld [vmem:[#allocation4 + $0x68] sm:$0xff] }
   0x9   :  { %v2140_v3 = vld [vmem:[#allocation4 + $0xf8] sm:$0xff]  ;;  %618 = vmatpush.bf16.msra.mxu2 %v2132_v2  ;;  %v2139_v7 = vld [vmem:[#allocation4 + $0xf0] sm:$0xff]  ;;  %v2130_v10 = vld [vmem:[#allocation4 + $0xa8] sm:$0xff] }
   0xa   :  { %631 = vmatpush.bf16.msra.mxu3 %v2140_v3  ;;  %v2138_v11 = vld [vmem:[#allocation4 + $0xe8] sm:$0xff]  ;;  %v2113_v12 = vld [vmem:[#allocation4 + $0x20] sm:$0xff]  ;;  %v2112_v16 = vld [vmem:[#allocation4 + $0x18] sm:$0xff] }
   0xb   :  { %593 = vmatpush.bf16.msra.mxu0 %v2115_v4  ;;  %v2121_v13 = vld [vmem:[#allocation4 + $0x60] sm:$0xff]  ;;  %v2120_v17 = vld [vmem:[#allocation4 + $0x58] sm:$0xff]  ;;  %v2111_v20 = vld [vmem:[#allocation4 + $0x10] sm:$0xff] }
   0xc   :  { %606 = vmatpush.bf16.msra.mxu1 %v2123_v5  ;;  %v2129_v14 = vld [vmem:[#allocation4 + $0xa0] sm:$0xff]  ;;  %v2128_v18 = vld [vmem:[#allocation4 + $0x98] sm:$0xff]  ;;  %v2119_v21 = vld [vmem:[#allocation4 + $0x50] sm:$0xff] }
   0xd   :  { %619 = vmatpush.bf16.msra.mxu2 %v2131_v6  ;;  %v2137_v15 = vld [vmem:[#allocation4 + $0xe0] sm:$0xff]  ;;  %v2136_v19 = vld [vmem:[#allocation4 + $0xd8] sm:$0xff]  ;;  %v2127_v22 = vld [vmem:[#allocation4 + $0x90] sm:$0xff] }
   0xe   :  { %632 = vmatpush.bf16.msra.mxu3 %v2139_v7  ;;  %v2135_v23 = vld [vmem:[#allocation4 + $0xd0] sm:$0xff]  ;;  %v2110_v24 = vld [vmem:[#allocation4 + $0x8] sm:$0xff]  ;;  %v48_v29 = vld [vmem:[%s2439_s0] sm:$0xff] }
   0xf   :  { %594 = vmatpush.bf16.msra.mxu0 %v2114_v8  ;;  %v2118_v25 = vld [vmem:[#allocation4 + $0x48] sm:$0xff]  ;;  %v2109_v30 = vld [vmem:[#allocation4] sm:$0xff]  ;;  %v184_v33 = vunpack.c.l.b16 %v48_v29  ;;  %v185_v37 = vunpack.c.h.b16 %v48_v29  ;;  %v2148_v38 = vld [vmem:[#allocation4 + $0x138] sm:$0xff] }
  0x10   :  { %607 = vmatpush.bf16.msra.mxu1 %v2122_v9  ;;  %v2126_v26 = vld [vmem:[#allocation4 + $0x88] sm:$0xff]  ;;  %v2117_v31 = vld [vmem:[#allocation4 + $0x40] sm:$0xff]  ;;  %v2156_v39 = vld [vmem:[#allocation4 + $0x178] sm:$0xff] }
  0x11   :  { %620 = vmatpush.bf16.msra.mxu2 %v2130_v10  ;;  %v2134_v27 = vld [vmem:[#allocation4 + $0xc8] sm:$0xff]  ;;  %v2125_v34 = vld [vmem:[#allocation4 + $0x80] sm:$0xff]  ;;  %v2164_v40 = vld [vmem:[#allocation4 + $0x1b8] sm:$0xff]  ;;  %v192_v43 = vpack.c.b16 %v184_v33, %v184_v33  ;;  %v193_v45 = vpack.c.b16 %v185_v37, %v185_v37 }
  0x12   :  { %633 = vmatpush.bf16.msra.mxu3 %v2138_v11  ;;  %v49_v28 = vld [vmem:[%s2439_s0 + $0x8] sm:$0xff]  ;;  %v2133_v35 = vld [vmem:[#allocation4 + $0xc0] sm:$0xff]  ;;  %v2172_v41 = vld [vmem:[#allocation4 + $0x1f8] sm:$0xff] }
  0x13   :  { %595 = vmatpush.bf16.msra.mxu0 %v2113_v12  ;;  %v186_v32 = vunpack.c.l.b16 %v49_v28  ;;  %v187_v36 = vunpack.c.h.b16 %v49_v28  ;;  %v2147_v46 = vld [vmem:[#allocation4 + $0x130] sm:$0xff]  ;;  %v2146_v50 = vld [vmem:[#allocation4 + $0x128] sm:$0xff]  ;;  %v2145_v54 = vld [vmem:[#allocation4 + $0x120] sm:$0xff] }
  0x14   :  { %608 = vmatpush.bf16.msra.mxu1 %v2121_v13  ;;  %v2155_v47 = vld [vmem:[#allocation4 + $0x170] sm:$0xff]  ;;  %v2154_v51 = vld [vmem:[#allocation4 + $0x168] sm:$0xff]  ;;  %v2153_v55 = vld [vmem:[#allocation4 + $0x160] sm:$0xff] }
  0x15   :  { %621 = vmatpush.bf16.msra.mxu2 %v2129_v14  ;;  %v194_v42 = vpack.c.b16 %v186_v32, %v186_v32  ;;  %v195_v44 = vpack.c.b16 %v187_v36, %v187_v36  ;;  %v2163_v48 = vld [vmem:[#allocation4 + $0x1b0] sm:$0xff]  ;;  %v2162_v52 = vld [vmem:[#allocation4 + $0x1a8] sm:$0xff]  ;;  %v2161_v56 = vld [vmem:[#allocation4 + $0x1a0] sm:$0xff] }
  0x16   :  { %634 = vmatpush.bf16.msra.mxu3 %v2137_v15  ;;  %v2171_v49 = vld [vmem:[#allocation4 + $0x1f0] sm:$0xff]  ;;  %v2170_v53 = vld [vmem:[#allocation4 + $0x1e8] sm:$0xff]  ;;  %v2169_v57 = vld [vmem:[#allocation4 + $0x1e0] sm:$0xff] }
  0x17   :  { %596 = vmatpush.bf16.msra.mxu0 %v2112_v16  ;;  %v2144_v58 = vld [vmem:[#allocation4 + $0x118] sm:$0xff]  ;;  %v2143_v62 = vld [vmem:[#allocation4 + $0x110] sm:$0xff]  ;;  %v2142_v2 = vld [vmem:[#allocation4 + $0x108] sm:$0xff] }
  0x18   :  { %609 = vmatpush.bf16.msra.mxu1 %v2120_v17  ;;  %v2152_v59 = vld [vmem:[#allocation4 + $0x158] sm:$0xff]  ;;  %v2151_v63 = vld [vmem:[#allocation4 + $0x150] sm:$0xff]  ;;  %v2150_v3 = vld [vmem:[#allocation4 + $0x148] sm:$0xff] }
  0x19   :  { %622 = vmatpush.bf16.msra.mxu2 %v2128_v18  ;;  %v2160_v60 = vld [vmem:[#allocation4 + $0x198] sm:$0xff]  ;;  %v2159_v0 = vld [vmem:[#allocation4 + $0x190] sm:$0xff]  ;;  %v2158_v5 = vld [vmem:[#allocation4 + $0x188] sm:$0xff] }
  0x1a   :  { %635 = vmatpush.bf16.msra.mxu3 %v2136_v19  ;;  %v2168_v61 = vld [vmem:[#allocation4 + $0x1d8] sm:$0xff]  ;;  %v2167_v1 = vld [vmem:[#allocation4 + $0x1d0] sm:$0xff]  ;;  %v2166_v6 = vld [vmem:[#allocation4 + $0x1c8] sm:$0xff] }
  0x1b   :  { %597 = vmatpush.bf16.msra.mxu0 %v2111_v20  ;;  %v50_v4 = vld [vmem:[%s2439_s0 + $0x10] sm:$0xff]  ;;  %v51_v7 = vld [vmem:[%s2439_s0 + $0x18] sm:$0xff]  ;;  %v2141_v10 = vld [vmem:[#allocation4 + $0x100] sm:$0xff] }
  0x1c   :  { %610 = vmatpush.bf16.msra.mxu1 %v2119_v21  ;;  %v188_v8 = vunpack.c.l.b16 %v50_v4  ;;  %v189_v9 = vunpack.c.h.b16 %v50_v4  ;;  %v2149_v11 = vld [vmem:[#allocation4 + $0x140] sm:$0xff]  ;;  %v190_v12 = vunpack.c.l.b16 %v51_v7  ;;  %v191_v13 = vunpack.c.h.b16 %v51_v7  ;;  %v2204_v16 = vld [vmem:[#allocation4 + $0xf8] sm:$0xff]  ;;  %v2202_v28 = vld [vmem:[#allocation4 + $0xe8] sm:$0xff] }
  0x1d   :  { %623 = vmatpush.bf16.msra.mxu2 %v2127_v22  ;;  %v2157_v14 = vld [vmem:[#allocation4 + $0x180] sm:$0xff]  ;;  %v2196_v17 = vld [vmem:[#allocation4 + $0xb8] sm:$0xff]  ;;  %v2194_v29 = vld [vmem:[#allocation4 + $0xa8] sm:$0xff] }
  0x1e   :  { %636 = vmatpush.bf16.msra.mxu3 %v2135_v23  ;;  %v2165_v15 = vld [vmem:[#allocation4 + $0x1c0] sm:$0xff]  ;;  %v196_v18 = vpack.c.b16 %v188_v8, %v188_v8  ;;  %v197_v19 = vpack.c.b16 %v189_v9, %v189_v9  ;;  %v198_v20 = vpack.c.b16 %v190_v12, %v190_v12  ;;  %v199_v21 = vpack.c.b16 %v191_v13, %v191_v13  ;;  %v2180_v22 = vld [vmem:[#allocation4 + $0x38] sm:$0xff] }
  0x1f   :  { %598 = vmatpush.bf16.msra.mxu0 %v2110_v24  ;;  %v2188_v23 = vld [vmem:[#allocation4 + $0x78] sm:$0xff]  ;;  %v2203_v24 = vld [vmem:[#allocation4 + $0xf0] sm:$0xff]  ;;  %v2201_v32 = vld [vmem:[#allocation4 + $0xe0] sm:$0xff] }
  0x20   :  { %611 = vmatpush.bf16.msra.mxu1 %v2118_v25  ;;  %v2195_v25 = vld [vmem:[#allocation4 + $0xb0] sm:$0xff]  ;;  %v2193_v33 = vld [vmem:[#allocation4 + $0xa0] sm:$0xff]  ;;  %v2200_v36 = vld [vmem:[#allocation4 + $0xd8] sm:$0xff] }
  0x21   :  { %624 = vmatpush.bf16.msra.mxu2 %v2126_v26  ;;  %v2179_v26 = vld [vmem:[#allocation4 + $0x30] sm:$0xff]  ;;  %v2192_v37 = vld [vmem:[#allocation4 + $0x98] sm:$0xff]  ;;  %v2209_v4 = vld [vmem:[#allocation4 + $0x120] sm:$0xff] }
  0x22   :  { %637 = vmatpush.bf16.msra.mxu3 %v2134_v27  ;;  %v2187_v27 = vld [vmem:[#allocation4 + $0x70] sm:$0xff]  ;;  %v2217_v9 = vld [vmem:[#allocation4 + $0x160] sm:$0xff] }
  0x23   :  { %599 = vmatpush.bf16.msra.mxu0 %v2109_v30  ;;  %v2178_v30 = vld [vmem:[#allocation4 + $0x28] sm:$0xff] }
  0x24   :  { %612 = vmatpush.bf16.msra.mxu1 %v2117_v31  ;;  %v2186_v31 = vld [vmem:[#allocation4 + $0x68] sm:$0xff] }
  0x25   :  { %625 = vmatpush.bf16.msra.mxu2 %v2125_v34  ;;  %v2177_v34 = vld [vmem:[#allocation4 + $0x20] sm:$0xff] }
  0x26   :  { %638 = vmatpush.bf16.msra.mxu3 %v2133_v35  ;;  %600 = vmatmul.bf16.vlgmr.msra.gmra.mxu0 %v192_v43  ;;  %v2185_v35 = vld [vmem:[#allocation4 + $0x60] sm:$0xff]  ;;  %v2183_v43 = vld [vmem:[#allocation4 + $0x50] sm:$0xff] }
  0x27   :  { %644 = vmatpush.bf16.msrb.mxu0 %v2148_v38  ;;  %613 = vmatmul.bf16.vlgmr.msra.gmra.mxu1 %v193_v45  ;;  %v2176_v38 = vld [vmem:[#allocation4 + $0x18] sm:$0xff]  ;;  %v2190_v45 = vld [vmem:[#allocation4 + $0x88] sm:$0xff] }
  0x28   :  { %657 = vmatpush.bf16.msrb.mxu1 %v2156_v39  ;;  %626 = vmatmul.bf16.vlgmr.msra.gmra.mxu2 %v194_v42  ;;  %v2184_v39 = vld [vmem:[#allocation4 + $0x58] sm:$0xff]  ;;  %v2175_v42 = vld [vmem:[#allocation4 + $0x10] sm:$0xff] }
  0x29   :  { %670 = vmatpush.bf16.msrb.mxu2 %v2164_v40  ;;  %639 = vmatmul.bf16.vlgmr.msra.gmra.mxu3 %v195_v44  ;;  %v2199_v40 = vld [vmem:[#allocation4 + $0xd0] sm:$0xff]  ;;  %v2198_v44 = vld [vmem:[#allocation4 + $0xc8] sm:$0xff] }
  0x2a   :  { %683 = vmatpush.bf16.msrb.mxu3 %v2172_v41  ;;  %v2191_v41 = vld [vmem:[#allocation4 + $0x90] sm:$0xff] }
  0x2b   :  { %645 = vmatpush.bf16.msrb.mxu0 %v2147_v46  ;;  %v2174_v46 = vld [vmem:[#allocation4 + $0x8] sm:$0xff] }
  0x2c   :  { %658 = vmatpush.bf16.msrb.mxu1 %v2155_v47  ;;  %v2182_v47 = vld [vmem:[#allocation4 + $0x48] sm:$0xff] }
  0x2d   :  { %671 = vmatpush.bf16.msrb.mxu2 %v2163_v48  ;;  %v2197_v48 = vld [vmem:[#allocation4 + $0xc0] sm:$0xff] }
  0x2e   :  { %684 = vmatpush.bf16.msrb.mxu3 %v2171_v49  ;;  %v2189_v49 = vld [vmem:[#allocation4 + $0x80] sm:$0xff] }
  0x2f   :  { %646 = vmatpush.bf16.msrb.mxu0 %v2146_v50  ;;  %v2236_v50 = vld [vmem:[#allocation4 + $0x1f8] sm:$0xff] }
  0x30   :  { %659 = vmatpush.bf16.msrb.mxu1 %v2154_v51  ;;  %v2228_v51 = vld [vmem:[#allocation4 + $0x1b8] sm:$0xff] }
  0x31   :  { %672 = vmatpush.bf16.msrb.mxu2 %v2162_v52  ;;  %v2173_v52 = vld [vmem:[#allocation4] sm:$0xff] }
  0x32   :  { %685 = vmatpush.bf16.msrb.mxu3 %v2170_v53  ;;  %v2181_v53 = vld [vmem:[#allocation4 + $0x40] sm:$0xff] }
  0x33   :  { %647 = vmatpush.bf16.msrb.mxu0 %v2145_v54  ;;  %v2212_v54 = vld [vmem:[#allocation4 + $0x138] sm:$0xff] }
  0x34   :  { %660 = vmatpush.bf16.msrb.mxu1 %v2153_v55  ;;  %v2235_v55 = vld [vmem:[#allocation4 + $0x1f0] sm:$0xff] }
  0x35   :  { %673 = vmatpush.bf16.msrb.mxu2 %v2161_v56  ;;  %v2234_v56 = vld [vmem:[#allocation4 + $0x1e8] sm:$0xff] }
  0x36   :  { %686 = vmatpush.bf16.msrb.mxu3 %v2169_v57  ;;  %v2220_v57 = vld [vmem:[#allocation4 + $0x178] sm:$0xff] }
  0x37   :  { %648 = vmatpush.bf16.msrb.mxu0 %v2144_v58  ;;  %v2227_v58 = vld [vmem:[#allocation4 + $0x1b0] sm:$0xff] }
  0x38   :  { %661 = vmatpush.bf16.msrb.mxu1 %v2152_v59  ;;  %v2211_v59 = vld [vmem:[#allocation4 + $0x130] sm:$0xff] }
  0x39   :  { %674 = vmatpush.bf16.msrb.mxu2 %v2160_v60  ;;  %v2219_v60 = vld [vmem:[#allocation4 + $0x170] sm:$0xff] }
  0x3a   :  { %687 = vmatpush.bf16.msrb.mxu3 %v2168_v61  ;;  %v2226_v61 = vld [vmem:[#allocation4 + $0x1a8] sm:$0xff] }
  0x3b   :  { %649 = vmatpush.bf16.msrb.mxu0 %v2143_v62  ;;  %v2210_v62 = vld [vmem:[#allocation4 + $0x128] sm:$0xff] }
  0x3c   :  { %662 = vmatpush.bf16.msrb.mxu1 %v2151_v63  ;;  %v700_v63 = vld [vmem:[%s2440_s1 + $0x8] sm:$0xff] }
  0x3d   :  { %675 = vmatpush.bf16.msrb.mxu2 %v2159_v0  ;;  %v2218_v0 = vld [vmem:[#allocation4 + $0x168] sm:$0xff] }
  0x3e   :  { %688 = vmatpush.bf16.msrb.mxu3 %v2167_v1  ;;  %v2225_v1 = vld [vmem:[#allocation4 + $0x1a0] sm:$0xff] }
  0x3f   :  { %650 = vmatpush.bf16.msrb.mxu0 %v2142_v2  ;;  %v837_v2 = vunpack.c.l.b16 %v700_v63 }
  0x40   :  { %663 = vmatpush.bf16.msrb.mxu1 %v2150_v3  ;;  %v2233_v3 = vld [vmem:[#allocation4 + $0x1e0] sm:$0xff] }
  0x41   :  { %676 = vmatpush.bf16.msrb.mxu2 %v2158_v5  ;;  %v699_v5 = vld [vmem:[%s2440_s1] sm:$0xff]  ;;  %v845_v7 = vpack.c.b16 %v837_v2, %v837_v2 }
  0x42   :  { %689 = vmatpush.bf16.msrb.mxu3 %v2166_v6  ;;  %v838_v6 = vunpack.c.h.b16 %v700_v63  ;;  %v835_v8 = vunpack.c.l.b16 %v699_v5  ;;  %v836_v13 = vunpack.c.h.b16 %v699_v5  ;;  %v1357_v5 = vld [vmem:[%s2443_s4 + $0x8] sm:$0xff] }
  0x43   :  { %651 = vmatpush.bf16.msrb.mxu0 %v2141_v10  ;;  %v2224_v10 = vld [vmem:[#allocation4 + $0x198] sm:$0xff] }
  0x44   :  { %664 = vmatpush.bf16.msrb.mxu1 %v2149_v11  ;;  %v846_v11 = vpack.c.b16 %v838_v6, %v838_v6  ;;  %v843_v12 = vpack.c.b16 %v835_v8, %v835_v8  ;;  %v1366_v6 = vld [vmem:[%s2443_s4 + $0x50] sm:$0xff]  ;;  %v1367_v8 = vld [vmem:[%s2443_s4 + $0x58] sm:$0xff] }
  0x45   :  { %677 = vmatpush.bf16.msrb.mxu2 %v2157_v14  ;;  %v2232_v14 = vld [vmem:[#allocation4 + $0x1d8] sm:$0xff] }
  0x46   :  { %690 = vmatpush.bf16.msrb.mxu3 %v2165_v15  ;;  %652 = vmatmul.bf16.vlgmr.msrb.gmra.mxu0 %v196_v18  ;;  %v2208_v15 = vld [vmem:[#allocation4 + $0x118] sm:$0xff]  ;;  %v2223_v18 = vld [vmem:[#allocation4 + $0x190] sm:$0xff] }
  0x47   :  { %665 = vmatmul.bf16.vlgmr.msrb.gmra.mxu1 %v197_v19  ;;  %1243 = vmatpush.bf16.msra.mxu0 %v2180_v22  ;;  %v2231_v19 = vld [vmem:[#allocation4 + $0x1d0] sm:$0xff]  ;;  %v2222_v22 = vld [vmem:[#allocation4 + $0x188] sm:$0xff] }
  0x48   :  { %678 = vmatmul.bf16.vlgmr.msrb.gmra.mxu2 %v198_v20  ;;  %1256 = vmatpush.bf16.msra.mxu1 %v2188_v23  ;;  %v2207_v20 = vld [vmem:[#allocation4 + $0x110] sm:$0xff]  ;;  %v2230_v23 = vld [vmem:[#allocation4 + $0x1c8] sm:$0xff] }
  0x49   :  { %1269 = vmatpush.bf16.msra.mxu2 %v2196_v17  ;;  %691 = vmatmul.bf16.vlgmr.msrb.gmra.mxu3 %v199_v21  ;;  %v2216_v17 = vld [vmem:[#allocation4 + $0x158] sm:$0xff]  ;;  %v2215_v21 = vld [vmem:[#allocation4 + $0x150] sm:$0xff] }
  0x4a   :  { %1282 = vmatpush.bf16.msra.mxu3 %v2204_v16  ;;  %v844_v16 = vpack.c.b16 %v836_v13, %v836_v13  ;;  %v1361_v13 = vld [vmem:[%s2443_s4 + $0x28] sm:$0xff] }
  0x4b   :  { %1244 = vmatpush.bf16.msra.mxu0 %v2179_v26  ;;  %v702_v26 = vld [vmem:[%s2440_s1 + $0x18] sm:$0xff] }
  0x4c   :  { %1257 = vmatpush.bf16.msra.mxu1 %v2187_v27  ;;  %v2214_v27 = vld [vmem:[#allocation4 + $0x148] sm:$0xff] }
  0x4d   :  { %1270 = vmatpush.bf16.msra.mxu2 %v2195_v25  ;;  %v2229_v25 = vld [vmem:[#allocation4 + $0x1c0] sm:$0xff] }
  0x4e   :  { %1283 = vmatpush.bf16.msra.mxu3 %v2203_v24  ;;  %v2206_v24 = vld [vmem:[#allocation4 + $0x108] sm:$0xff] }
  0x4f   :  { %1245 = vmatpush.bf16.msra.mxu0 %v2178_v30  ;;  %v2205_v30 = vld [vmem:[#allocation4 + $0x100] sm:$0xff] }
  0x50   :  { %1258 = vmatpush.bf16.msra.mxu1 %v2186_v31  ;;  %v701_v31 = vld [vmem:[%s2440_s1 + $0x10] sm:$0xff] }
  0x51   :  { %1271 = vmatpush.bf16.msra.mxu2 %v2194_v29  ;;  %v841_v29 = vunpack.c.l.b16 %v702_v26 }
  0x52   :  { %1284 = vmatpush.bf16.msra.mxu3 %v2202_v28  ;;  %v2221_v28 = vld [vmem:[#allocation4 + $0x180] sm:$0xff] }
  0x53   :  { %1246 = vmatpush.bf16.msra.mxu0 %v2177_v34  ;;  %v839_v34 = vunpack.c.l.b16 %v701_v31 }
  0x54   :  { %1259 = vmatpush.bf16.msra.mxu1 %v2185_v35  ;;  %v2213_v35 = vld [vmem:[#allocation4 + $0x140] sm:$0xff] }
  0x55   :  { %1272 = vmatpush.bf16.msra.mxu2 %v2193_v33  ;;  %v849_v33 = vpack.c.b16 %v841_v29, %v841_v29 }
  0x56   :  { %1285 = vmatpush.bf16.msra.mxu3 %v2201_v32  ;;  %v842_v32 = vunpack.c.h.b16 %v702_v26 }
  0x57   :  { %1247 = vmatpush.bf16.msra.mxu0 %v2176_v38  ;;  %v840_v38 = vunpack.c.h.b16 %v701_v31 }
  0x58   :  { %1260 = vmatpush.bf16.msra.mxu1 %v2184_v39 }
  0x59   :  { %1273 = vmatpush.bf16.msra.mxu2 %v2192_v37  ;;  %v847_v37 = vpack.c.b16 %v839_v34, %v839_v34  ;;  %v848_v39 = vpack.c.b16 %v840_v38, %v840_v38 }
  0x5a   :  { %1286 = vmatpush.bf16.msra.mxu3 %v2200_v36  ;;  %v850_v36 = vpack.c.b16 %v842_v32, %v842_v32 }
  0x5b   :  { %1248 = vmatpush.bf16.msra.mxu0 %v2175_v42 }
  0x5c   :  { %1261 = vmatpush.bf16.msra.mxu1 %v2183_v43 }
  0x5d   :  { %1274 = vmatpush.bf16.msra.mxu2 %v2191_v41 }
  0x5e   :  { %1287 = vmatpush.bf16.msra.mxu3 %v2199_v40 }
  0x5f   :  { %1249 = vmatpush.bf16.msra.mxu0 %v2174_v46 }
  0x60   :  { %1262 = vmatpush.bf16.msra.mxu1 %v2182_v47 }
  0x61   :  { %1275 = vmatpush.bf16.msra.mxu2 %v2190_v45 }
  0x62   :  { %1288 = vmatpush.bf16.msra.mxu3 %v2198_v44 }
  0x63   :  { %1250 = vmatpush.bf16.msra.mxu0 %v2173_v52 }
  0x64   :  { %1263 = vmatpush.bf16.msra.mxu1 %v2181_v53 }
  0x65   :  { %1276 = vmatpush.bf16.msra.mxu2 %v2189_v49 }
  0x66   :  { %1289 = vmatpush.bf16.msra.mxu3 %v2197_v48  ;;  %1251 = vmatmul.bf16.vlgmr.msra.gmra.mxu0 %v843_v12  ;;  %v1369_v12 = vld [vmem:[%s2443_s4 + $0x68] sm:$0xff] }
  0x67   :  { %1295 = vmatpush.bf16.msrb.mxu0 %v2212_v54  ;;  %1264 = vmatmul.bf16.vlgmr.msra.gmra.mxu1 %v844_v16  ;;  %v1371_v16 = vld [vmem:[%s2443_s4 + $0x78] sm:$0xff] }
  0x68   :  { %1308 = vmatpush.bf16.msrb.mxu1 %v2220_v57  ;;  %1277 = vmatmul.bf16.vlgmr.msra.gmra.mxu2 %v845_v7  ;;  %v1358_v7 = vld [vmem:[%s2443_s4 + $0x10] sm:$0xff] }
  0x69   :  { %1321 = vmatpush.bf16.msrb.mxu2 %v2228_v51  ;;  %1290 = vmatmul.bf16.vlgmr.msra.gmra.mxu3 %v846_v11  ;;  %v1360_v11 = vld [vmem:[%s2443_s4 + $0x20] sm:$0xff] }
  0x6a   :  { %1334 = vmatpush.bf16.msrb.mxu3 %v2236_v50 }
  0x6b   :  { %1296 = vmatpush.bf16.msrb.mxu0 %v2211_v59 }
  0x6c   :  { %1309 = vmatpush.bf16.msrb.mxu1 %v2219_v60 }
  0x6d   :  { %1322 = vmatpush.bf16.msrb.mxu2 %v2227_v58  ;;  %v2363_v58 = vld [vmem:[%s2442_s3] ss:$0 sm:$0xff] }
  0x6e   :  { %1335 = vmatpush.bf16.msrb.mxu3 %v2235_v55 }
  0x6f   :  { %1297 = vmatpush.bf16.msrb.mxu0 %v2210_v62 }
  0x70   :  { %1310 = vmatpush.bf16.msrb.mxu1 %v2218_v0  ;;  %v1364_v0 = vld [vmem:[%s2443_s4 + $0x40] sm:$0xff] }
  0x71   :  { %1323 = vmatpush.bf16.msrb.mxu2 %v2226_v61 }
  0x72   :  { %1336 = vmatpush.bf16.msrb.mxu3 %v2234_v56 }
  0x73   :  { %1298 = vmatpush.bf16.msrb.mxu0 %v2209_v4  ;;  %v1365_v4 = vld [vmem:[%s2443_s4 + $0x48] sm:$0xff] }
  0x74   :  { %1311 = vmatpush.bf16.msrb.mxu1 %v2217_v9  ;;  %v1359_v9 = vld [vmem:[%s2443_s4 + $0x18] sm:$0xff] }
  0x75   :  { %1324 = vmatpush.bf16.msrb.mxu2 %v2225_v1 }
  0x76   :  { %1337 = vmatpush.bf16.msrb.mxu3 %v2233_v3  ;;  %v1356_v3 = vld [vmem:[%s2443_s4] sm:$0xff] }
  0x77   :  { %1299 = vmatpush.bf16.msrb.mxu0 %v2208_v15  ;;  %v1362_v15 = vld [vmem:[%s2443_s4 + $0x30] sm:$0xff] }
  0x78   :  { %1312 = vmatpush.bf16.msrb.mxu1 %v2216_v17 }
  0x79   :  { %1325 = vmatpush.bf16.msrb.mxu2 %v2224_v10  ;;  %v1368_v10 = vld [vmem:[%s2443_s4 + $0x60] sm:$0xff] }
  0x7a   :  { %1338 = vmatpush.bf16.msrb.mxu3 %v2232_v14  ;;  %v1370_v14 = vld [vmem:[%s2443_s4 + $0x70] sm:$0xff] }
  0x7b   :  { %1300 = vmatpush.bf16.msrb.mxu0 %v2207_v20 }
  0x7c   :  { %1313 = vmatpush.bf16.msrb.mxu1 %v2215_v21 }
  0x7d   :  { %1326 = vmatpush.bf16.msrb.mxu2 %v2223_v18  ;;  %v1363_v18 = vld [vmem:[%s2443_s4 + $0x38] sm:$0xff]  ;;  %s2302_s4 = smov [#allocation7]  }
  0x7e   :  { %1339 = vmatpush.bf16.msrb.mxu3 %v2231_v19  ;;  %s1569_s3 = sshll.u32 %s2302_s4, 4  ;;  %s1570_s3 = int_to_ptr.vmem [resolvable:$true] %s1569_s3 }
  0x7f   :  { %1301 = vmatpush.bf16.msrb.mxu0 %v2206_v24 }
  0x80   :  { %1314 = vmatpush.bf16.msrb.mxu1 %v2214_v27 }
  0x81   :  { %1327 = vmatpush.bf16.msrb.mxu2 %v2222_v22 }
  0x82   :  { %1340 = vmatpush.bf16.msrb.mxu3 %v2230_v23 }
  0x83   :  { %1302 = vmatpush.bf16.msrb.mxu0 %v2205_v30 }
  0x84   :  { %1315 = vmatpush.bf16.msrb.mxu1 %v2213_v35 }
  0x85   :  { %1328 = vmatpush.bf16.msrb.mxu2 %v2221_v28 }
  0x86   :  { %1341 = vmatpush.bf16.msrb.mxu3 %v2229_v25  ;;  %1303 = vmatmul.bf16.vlgmr.msrb.gmra.mxu0 %v847_v37 }
  0x87   :  { %1316 = vmatmul.bf16.vlgmr.msrb.gmra.mxu1 %v848_v39 }
  0x88   :  { %1329 = vmatmul.bf16.vlgmr.msrb.gmra.mxu2 %v849_v33 }
  0x89   :  { %1342 = vmatmul.bf16.vlgmr.msrb.gmra.mxu3 %v850_v36 }
  0xa3   :  { %v601_v40 = vpop.f32.mrf.mxu0 }
  0xa4   :  { %v614_v41 = vpop.f32.mrf.mxu1 }
  0xa5   :  { %v615_v48 = vadd.f32 %v614_v41, %v601_v40 }
  0xab   :  { %v627_v42 = vpop.f32.mrf.mxu2  ;;  %v603_v44 = vpop.f32.mrf.mxu0 }
  0xac   :  { %v640_v43 = vpop.f32.mrf.mxu3  ;;  %v616_v45 = vpop.f32.mrf.mxu1  ;;  %v628_v49 = vadd.f32 %v627_v42, %v615_v48 }
  0xae   :  { %v641_v50 = vadd.f32 %v640_v43, %v628_v49 }
  0xb3   :  { %v629_v46 = vpop.f32.mrf.mxu2 }
  0xb4   :  { %v642_v47 = vpop.f32.mrf.mxu3 }
  0xc3   :  { %v653_v51 = vpop.f32.mrf.mxu0 }
  0xc4   :  { %v666_v52 = vpop.f32.mrf.mxu1  ;;  %v654_v53 = vadd.f32 %v653_v51, %v641_v50 }
  0xc6   :  { %v667_v54 = vadd.f32 %v666_v52, %v654_v53 }
  0xcb   :  { %v679_v55 = vpop.f32.mrf.mxu2  ;;  %v655_v59 = vpop.f32.mrf.mxu0 }
  0xcc   :  { %v692_v56 = vpop.f32.mrf.mxu3  ;;  %v680_v57 = vadd.f32 %v679_v55, %v667_v54  ;;  %v668_v60 = vpop.f32.mrf.mxu1 }
  0xce   :  { %v693_v61 = vadd.f32 %v692_v56, %v680_v57 }
  0xd0   :  { %v696_v62 = vadd.f32 %v2363_v58, %v693_v61 }
  0xd2   :  { %v1353_v63 = vmax.f32 %v696_v62, 0.0 }
  0xd3   :  { %v681_v1 = vpop.f32.mrf.mxu2 }
  0xd4   :  { %v694_v2 = vpop.f32.mrf.mxu3  ;;  %1436 = vmatpush.msra.mxu0 %v1353_v63  ;;  %2237 = vmatpush.msra.mxu3 %v1353_v63 }
  0xd5   :  { %2101 = vmatmul.msk.f32.vlgmr.msra.gmra.mxu3 %vm1372_vm0, %v1364_v0  ;;  %2093 = vmatmul.msk.f32.vlgmr.msra.gmra.mxu0 %vm1372_vm0, %v1356_v3 }
  0xdd   :  { %2102 = vmatmul.msk.f32.gmra.mxu3 %vm1372_vm0, %v1365_v4  ;;  %2094 = vmatmul.msk.f32.gmra.mxu0 %vm1372_vm0, %v1357_v5 }
  0xe3   :  { %v1252_v17 = vpop.f32.mrf.mxu0 }
  0xe4   :  { %v1265_v19 = vpop.f32.mrf.mxu1 }
  0xe5   :  { %2103 = vmatmul.msk.f32.gmra.mxu3 %vm1372_vm0, %v1366_v6  ;;  %2095 = vmatmul.msk.f32.gmra.mxu0 %vm1372_vm0, %v1358_v7  ;;  %v1266_v21 = vadd.f32 %v1265_v19, %v1252_v17 }
  0xeb   :  { %v1278_v20 = vpop.f32.mrf.mxu2  ;;  %v1254_v23 = vpop.f32.mrf.mxu0 }
  0xec   :  { %v1291_v22 = vpop.f32.mrf.mxu3  ;;  %v1279_v24 = vadd.f32 %v1278_v20, %v1266_v21  ;;  %v1267_v25 = vpop.f32.mrf.mxu1 }
  0xed   :  { %2104 = vmatmul.msk.f32.gmra.mxu3 %vm1372_vm0, %v1367_v8  ;;  %2096 = vmatmul.msk.f32.gmra.mxu0 %vm1372_vm0, %v1359_v9 }
  0xee   :  { %v1292_v27 = vadd.f32 %v1291_v22, %v1279_v24 }
  0xf3   :  { %v1280_v26 = vpop.f32.mrf.mxu2 }
  0xf4   :  { %v1293_v28 = vpop.f32.mrf.mxu3 }
  0xf5   :  { %2105 = vmatmul.msk.f32.gmra.mxu3 %vm1372_vm0, %v1368_v10  ;;  %2097 = vmatmul.msk.f32.gmra.mxu0 %vm1372_vm0, %v1360_v11 }
  0xfd   :  { %2106 = vmatmul.msk.f32.gmra.mxu3 %vm1372_vm0, %v1369_v12  ;;  %2098 = vmatmul.msk.f32.gmra.mxu0 %vm1372_vm0, %v1361_v13  ;;  %v2301_v12 = vmov 1.0  }
 0x103   :  { %v1304_v29 = vpop.f32.mrf.mxu0 }
 0x104   :  { %v1305_v30 = vadd.f32 %v1304_v29, %v1292_v27  ;;  %v1317_v31 = vpop.f32.mrf.mxu1 }
 0x105   :  { %2107 = vmatmul.msk.f32.gmra.mxu3 %vm1372_vm0, %v1370_v14  ;;  %2099 = vmatmul.msk.f32.gmra.mxu0 %vm1372_vm0, %v1362_v15 }
 0x106   :  { %v1318_v32 = vadd.f32 %v1317_v31, %v1305_v30 }
 0x10b   :  { %v1330_v33 = vpop.f32.mrf.mxu2  ;;  %v1306_v37 = vpop.f32.mrf.mxu0 }
 0x10c   :  { %v1343_v34 = vpop.f32.mrf.mxu3  ;;  %v1331_v35 = vadd.f32 %v1330_v33, %v1318_v32  ;;  %v1319_v39 = vpop.f32.mrf.mxu1 }
 0x10d   :  { %2108 = vmatmul.msk.f32.gmra.mxu3 %vm1372_vm0, %v1371_v16  ;;  %2100 = vmatmul.msk.f32.gmra.mxu0 %vm1372_vm0, %v1363_v18 }
 0x10e   :  { %v1344_v36 = vadd.f32 %v1343_v34, %v1331_v35 }
 0x110   :  { %v1347_v38 = vadd.f32 %v2363_v58, %v1344_v36 }
 0x112   :  { %v2431_v40 = vmax.f32 %v1347_v38, 0.0 }
 0x113   :  { %v1332_v41 = vpop.f32.mrf.mxu2 }
 0x114   :  { %v1345_v42 = vpop.f32.mrf.mxu3  ;;  %v1542_v43 = vmul.f32 %v2431_v40, %v2431_v40 }
 0x116   :  { %1543 = vadd.xlane.f32.xlu0 %v1542_v43 }
 0x152   :  { %v1438_v46 = vpop.f32.mrf.mxu0 }
 0x153   :  { %v1506_v11 = vmul.f32 %v1438_v46, %v1438_v46 }
 0x158   :  { %v1462_v44 = vpop.f32.mrf.mxu3 }
 0x159   :  { %v1514_v3 = vmul.f32 %v1462_v44, %v1462_v44 }
 0x15a   :  { %v1441_v49 = vpop.f32.mrf.mxu0 }
 0x15b   :  { %v1507_v10 = vmul.f32 %v1441_v49, %v1441_v49 }
 0x160   :  { %v1465_v45 = vpop.f32.mrf.mxu3 }
 0x161   :  { %v1515_v1 = vmul.f32 %v1465_v45, %v1465_v45 }
 0x162   :  { %v1444_v51 = vpop.f32.mrf.mxu0 }
 0x163   :  { %v1508_v9 = vmul.f32 %v1444_v51, %v1444_v51 }
 0x168   :  { %v1468_v47 = vpop.f32.mrf.mxu3 }
 0x169   :  { %v1516_v0 = vmul.f32 %v1468_v47, %v1468_v47 }
 0x16a   :  { %v1447_v53 = vpop.f32.mrf.mxu0 }
 0x16b   :  { %v1509_v8 = vmul.f32 %v1447_v53, %v1447_v53 }
 0x170   :  { %v1471_v48 = vpop.f32.mrf.mxu3 }
 0x171   :  { %v1517_v62 = vmul.f32 %v1471_v48, %v1471_v48 }
 0x172   :  { %v1450_v55 = vpop.f32.mrf.mxu0 }
 0x173   :  { %v1510_v7 = vmul.f32 %v1450_v55, %v1450_v55 }
 0x178   :  { %v1474_v50 = vpop.f32.mrf.mxu3 }
 0x179   :  { %v1518_v61 = vmul.f32 %v1474_v50, %v1474_v50 }
 0x17a   :  { %v1453_v59 = vpop.f32.mrf.mxu0 }
 0x17b   :  { %v1511_v6 = vmul.f32 %v1453_v59, %v1453_v59 }
 0x180   :  { %v1477_v52 = vpop.f32.mrf.mxu3 }
 0x181   :  { %v1519_v60 = vmul.f32 %v1477_v52, %v1477_v52 }
 0x182   :  { %v1456_v63 = vpop.f32.mrf.mxu0 }
 0x183   :  { %v1512_v5 = vmul.f32 %v1456_v63, %v1456_v63 }
 0x188   :  { %v1480_v54 = vpop.f32.mrf.mxu3 }
 0x189   :  { %v1520_v58 = vmul.f32 %v1480_v54, %v1480_v54  ;;  %v1544_v16 = vpop.xlane.xlu0 %1543 }
 0x18a   :  { %v1459_v2 = vpop.f32.mrf.mxu0 }
 0x18b   :  { %v1513_v4 = vmul.f32 %v1459_v2, %v1459_v2 }
 0x190   :  { %v1483_v56 = vpop.f32.mrf.mxu3 }
 0x191   :  { %v1521_v57 = vmul.f32 %v1483_v56, %v1483_v56  ;;  %1486 = vmatpush.xpose.msra.mxu1 %v1483_v56 }
 0x193   :  { %1522 = vmatpush.xpose.msra.mxu2 %v1521_v57 }
 0x195   :  { %1487 = vmatpush.xpose.msra.mxu1 %v1480_v54 }
 0x197   :  { %1523 = vmatpush.xpose.msra.mxu2 %v1520_v58 }
 0x199   :  { %1488 = vmatpush.xpose.msra.mxu1 %v1477_v52 }
 0x19b   :  { %1524 = vmatpush.xpose.msra.mxu2 %v1519_v60 }
 0x19d   :  { %1489 = vmatpush.xpose.msra.mxu1 %v1474_v50 }
 0x19f   :  { %1525 = vmatpush.xpose.msra.mxu2 %v1518_v61 }
 0x1a1   :  { %1490 = vmatpush.xpose.msra.mxu1 %v1471_v48 }
 0x1a3   :  { %1526 = vmatpush.xpose.msra.mxu2 %v1517_v62 }
 0x1a5   :  { %1491 = vmatpush.xpose.msra.mxu1 %v1468_v47 }
 0x1a7   :  { %1527 = vmatpush.xpose.msra.mxu2 %v1516_v0 }
 0x1a9   :  { %1492 = vmatpush.xpose.msra.mxu1 %v1465_v45 }
 0x1ab   :  { %1528 = vmatpush.xpose.msra.mxu2 %v1515_v1 }
 0x1ad   :  { %1493 = vmatpush.xpose.msra.mxu1 %v1462_v44 }
 0x1af   :  { %1529 = vmatpush.xpose.msra.mxu2 %v1514_v3 }
 0x1b1   :  { %1494 = vmatpush.xpose.msra.mxu1 %v1459_v2 }
 0x1b3   :  { %1530 = vmatpush.xpose.msra.mxu2 %v1513_v4 }
 0x1b5   :  { %1495 = vmatpush.xpose.msra.mxu1 %v1456_v63 }
 0x1b7   :  { %1531 = vmatpush.xpose.msra.mxu2 %v1512_v5 }
 0x1b9   :  { %1496 = vmatpush.xpose.msra.mxu1 %v1453_v59 }
 0x1bb   :  { %1532 = vmatpush.xpose.msra.mxu2 %v1511_v6 }
 0x1bd   :  { %1497 = vmatpush.xpose.msra.mxu1 %v1450_v55 }
 0x1bf   :  { %1533 = vmatpush.xpose.msra.mxu2 %v1510_v7 }
 0x1c1   :  { %1498 = vmatpush.xpose.msra.mxu1 %v1447_v53 }
 0x1c3   :  { %1534 = vmatpush.xpose.msra.mxu2 %v1509_v8 }
 0x1c5   :  { %1499 = vmatpush.xpose.msra.mxu1 %v1444_v51 }
 0x1c7   :  { %1535 = vmatpush.xpose.msra.mxu2 %v1508_v9 }
 0x1c9   :  { %1500 = vmatpush.xpose.msra.mxu1 %v1441_v49 }
 0x1cb   :  { %1536 = vmatpush.xpose.msra.mxu2 %v1507_v10 }
 0x1cd   :  { %1501 = vmatpush.xpose.msra.mxu1 %v1438_v46 }
 0x1cf   :  { %1537 = vmatpush.xpose.msra.mxu2 %v1506_v11 }
 0x1d0   :  { %1502 = vmatmul.f32.vlgmr.msra.gmra.mxu1 %v2431_v40 }
 0x1d2   :  { %1538 = vmatmul.f32.vlgmr.msra.gmra.mxu2 %v2301_v12 }
 0x24d   :  { %v1503_v13 = vpop.f32.mrf.mxu1 }
 0x24e   :  { %v1547_v17 = vmul.f32 2.0, %v1503_v13 }
 0x255   :  { %v1539_v14 = vpop.f32.mrf.mxu2 }
 0x256   :  { %v1545_v15 = vperm.slane %v1539_v14, 0 }
 0x258   :  { %v1546_v18 = vadd.f32 %v1545_v15, %v1544_v16 }
 0x25a   :  { %v1548_v19 = vsub.f32 %v1546_v18, %v1547_v17 }
 0x25c   :  { %v1549_v20 = vmax.f32 %v1548_v19, 0.0 }
 0x25e   :  { %2244 = vrsqrt.f32 %v1549_v20  ;;  %vm1557_vm1 = vcmp.eq.f32.partialorder %v1549_v20, inf  ;;  %v1560_v28 = vand.u32 2147483648, %v1549_v20  ;;  %vm1559_vm2 = vcmp.eq.f32.partialorder %v1549_v20, 0.0 }
 0x264   :  { %v2245_v21 = vpop.eup %2244 }
 0x265   :  { %v1551_v22 = vmul.f32 %v2245_v21, %v1549_v20 }
 0x267   :  { %v1552_v23 = vmul.f32 %v2245_v21, %v1551_v22 }
 0x269   :  { %v1553_v24 = vmul.f32 0.5, %v1552_v23 }
 0x26b   :  { %v1554_v25 = vsub.f32 1.5, %v1553_v24 }
 0x26d   :  { %v1555_v26 = vmul.f32 %v2245_v21, %v1554_v25 }
 0x26f   :  { %v1556_v27 = vmul.f32 %v1555_v26, %v1549_v20 }
 0x271   :  { %v1558_v29 = vsel %vm1557_vm1, %v1549_v20, %v1556_v27 }
 0x272   :  { %v1561_v30 = vsel %vm1559_vm2, %v1560_v28, %v1558_v29 }
 0x273   :  { %v1562_v31 = vsub.f32 0.0, %v1561_v30 }
 0x275   :  { %1563 = vst [vmem:[#allocation7] sm:$0xff] %v1562_v31 }
 0x276   :  { %1574 = dma.vmem_to_hbm [thread:$0]  %s1570_s3, 128, %s1572_s20, [#allocation6]  }
 0x277   :  { %2296 = dma.done.wait [#allocation6], 128  }
 0x278   :  { %2297 = vsyncadd [#allocation6], 4294967168 }
 0x279   :  { %1579 = vsyncpa [#allocation5], 1 }
 0x27a   :  { %1580 = vsyncpa [#allocation6], 1 }

</bundles_post_ra>
